<compile_context>
chip_gen: v6e
topology: v6e:2x2x1
jax: 0.10.0
libtpu: 0.0.40
codegen_flags: <defaults>
</compile_context>

<pallas_src>
import jax
import jax.numpy as jnp
from jax.experimental import pallas as pl
from jax.experimental.pallas import tpu as pltpu

SEQ = 8        # sublane count of one f32 vreg
HIDDEN = 32    # origin nn.Linear(32, 32)
LANE = 128     # lane-dense padded output width


# ----------------------------- Pallas kernel ------------------------------ #
def _linear_kernel(x_ref, w_ref, b_ref, o_ref):
    # x_ref: [S, IN]   w_ref: [IN, 128]   b_ref: [1, 128]   o_ref: [S, 128]
    # Single MXU matmul with f32 accumulation + VPU bias epilogue; output tile
    # is one full vreg -> unmasked vector stores.
    acc = jnp.dot(x_ref[...], w_ref[...], preferred_element_type=jnp.float32)
    o_ref[...] = (acc + b_ref[...]).astype(o_ref.dtype)


def _pallas_linear_padded(x, w_t_pad, b_pad):
    """y_pad = x @ w_t_pad + b_pad, single VMEM block (no grid)."""
    S = x.shape[0]
    return pl.pallas_call(
        _linear_kernel,
        out_shape=jax.ShapeDtypeStruct((S, LANE), x.dtype),
        in_specs=[
            pl.BlockSpec(memory_space=pltpu.VMEM),  # x   [S, IN]
            pl.BlockSpec(memory_space=pltpu.VMEM),  # w_t [IN, 128]
            pl.BlockSpec(memory_space=pltpu.VMEM),  # b   [1, 128]
        ],
        out_specs=pl.BlockSpec(memory_space=pltpu.VMEM),
    )(x, w_t_pad, b_pad)


# ----------------------- Origin module (nn.Linear) ------------------------ #
class PallasLinear:
    """Equivalent of the origin nn.Linear(HIDDEN, HIDDEN): y = x @ W.T + b.

    Weight/bias are pre-transposed and zero-padded to a lane-dense (OUT=128)
    layout once at construction; the per-call path is one pallas_call plus a
    slice back to the true output width.
    """

    def __init__(self, w, b):
        out_features, in_features = w.shape
        self.out_features = out_features
        # [out, in] -> [in, out], zero-padded on the lane (out) axis to 128.
        w_t_pad = jnp.zeros((in_features, LANE), dtype=w.dtype)
        self.w_t_pad = w_t_pad.at[:, :out_features].set(jnp.transpose(w))
        b_pad = jnp.zeros((1, LANE), dtype=b.dtype)
        self.b_pad = b_pad.at[:, :out_features].set(b.reshape(1, -1))

        @jax.jit
        def _fwd(x):
            y_pad = _pallas_linear_padded(x, self.w_t_pad, self.b_pad)
            return y_pad[:, : self.out_features]

        self._fwd = _fwd

    def __call__(self, x):
        return self._fwd(x)


# -------------------------- Cached module wrapper -------------------------- #
class CachedPallasModule:
    """JAX/Pallas equivalent of `_CachedModule`: memoizes the origin module's
    forward result (returns the stale cached value for any later args, by
    design); `reset()` clears the cache."""

    def __init__(self, origin_module):
        self.origin_module = origin_module
        self.cache = None

    def __call__(self, *args, **kwargs):
        if self.cache is not None:
            return self.cache
        result = self.origin_module(*args, **kwargs)
        self.cache = result
        return result

    def reset(self):
        self.cache = None


# --------------------------------- Main ------------------------------------ #
if __name__ == "__main__":
    key = jax.random.PRNGKey(0)
    kx, kw, kb = jax.random.split(key, 3)

    # Deterministic "origin module" parameters (nn.Linear(HIDDEN, HIDDEN)).
    x = jax.random.normal(kx, (SEQ, HIDDEN), dtype=jnp.float32)
    w = jax.random.normal(kw, (HIDDEN, HIDDEN), dtype=jnp.float32) * 0.1  # [out, in]
    b = jax.random.normal(kb, (HIDDEN,), dtype=jnp.float32) * 0.1

    origin = PallasLinear(w, b)
    cached_module = CachedPallasModule(origin)

    # First call: runs the Pallas kernel and caches the result.
    y1 = jax.block_until_ready(cached_module(x))

    # Second call (even with different args): must return the cached object.
    x_other = x + 1.0
    y2 = jax.block_until_ready(cached_module(x_other))
    assert y2 is y1, "cache miss: second call did not return cached result"

    # reset() clears the cache -> recompute through the kernel.
    cached_module.reset()
    y3 = jax.block_until_ready(cached_module(x))

    # Numerical check against plain-JAX reference of the origin module.
    ref = x @ w.T + b
    assert y1.shape == (SEQ, HIDDEN)
    assert jnp.allclose(y1, ref, atol=1e-4, rtol=1e-4), "kernel mismatch vs reference"
    assert jnp.allclose(y3, ref, atol=1e-4, rtol=1e-4), "recompute after reset mismatch"

    print("KERNEL_OK")
</pallas_src>

<mosaic_0001>
module attributes {stable_mosaic.version = 11 : i64} {
  func.func @_linear_kernel(%arg0: memref<8x32xf32, #tpu.memory_space<vmem>>, %arg1: memref<32x128xf32, #tpu.memory_space<vmem>>, %arg2: memref<1x128xf32, #tpu.memory_space<vmem>>, %arg3: memref<8x128xf32, #tpu.memory_space<vmem>>) attributes {dimension_semantics = [], scalar_prefetch = 0 : i64, scratch_operands = 0 : i64, tpu.core_type = #tpu.core_type<tc>} {
    %c0 = arith.constant 0 : index
    %c0_0 = arith.constant 0 : index
    %0 = vector.load %arg0[%c0, %c0_0] : memref<8x32xf32, #tpu.memory_space<vmem>>, vector<8x32xf32>
    %c0_1 = arith.constant 0 : index
    %c0_2 = arith.constant 0 : index
    %1 = vector.load %arg1[%c0_1, %c0_2] : memref<32x128xf32, #tpu.memory_space<vmem>>, vector<32x128xf32>
    %cst = arith.constant dense<0.000000e+00> : vector<8x128xf32>
    %2 = tpu.matmul %0, %1, %cst {dimension_numbers = #tpu.dot_dimension_numbers<[1], [0], [0], [1], [0, 0, 1, 1], [], []>} : vector<8x32xf32>, vector<32x128xf32>, vector<8x128xf32> -> vector<8x128xf32>
    %c0_3 = arith.constant 0 : index
    %c0_4 = arith.constant 0 : index
    %3 = vector.load %arg2[%c0_3, %c0_4] : memref<1x128xf32, #tpu.memory_space<vmem>>, vector<1x128xf32>
    %4 = vector.broadcast %3 : vector<1x128xf32> to vector<8x128xf32>
    %5 = arith.addf %2, %4 : vector<8x128xf32>
    %c0_5 = arith.constant 0 : index
    %c0_6 = arith.constant 0 : index
    %6 = vector.load %arg3[%c0_5, %c0_6] : memref<8x128xf32, #tpu.memory_space<vmem>>, vector<8x128xf32>
    tpu.vector_store %arg3[%c0_5, %c0_6], %5 {strides = array<i32>} : memref<8x128xf32, #tpu.memory_space<vmem>>, vector<8x128xf32>,
    return
  }
}

</mosaic_0001>

<bundles_post_ra>
// kernel: _fwd.1
= control target key start
LH: loop header
LB: loop body
LE: loop exit
PB: predicated region body
PF: predicated region fallthrough
CT: control target
= control target key end

     0   :  { %8 = vsyncpa [#allocation3], 0  ;;  %s274_s0 = inlined_call_operand.hbm [shape: f32[8,32], index: 0, kind: input, shape index: {}]   ;;  %s275_s1 = inlined_call_operand.hbm [shape: f32[32,128], index: 1, kind: input, shape index: {}]   ;;  %s276_s2 = inlined_call_operand.vmem [shape: f32[1,128], index: 2, kind: input, shape index: {}]   ;;  %s277_s3 = inlined_call_operand.hbm [shape: f32[8,128], index: 3, kind: output, shape index: {}]  }
   0x1   :  { %9 = vsyncpa [#allocation6], 0 }
   0x2   :  { %10 = vsyncpa [#allocation4], 0  ;;  %s235_s12 = smov [#allocation2]   ;;  %s236_s14 = smov [#allocation5]  }
   0x3   :  { %s17_s13 = sshll.u32 %s235_s12, 4  ;;  %s26_s15 = sshll.u32 %s236_s14, 4  ;;  %s18_s13 = int_to_ptr.vmem [resolvable:$true] %s17_s13  ;;  %s27_s15 = int_to_ptr.vmem [resolvable:$true] %s26_s15 }
   0x4   :  { %s177_s16 = scalar_lea.vmem %s18_s13, 128  ;;  %p182_p1 = scmp.lt.s32.totalorder %s18_s13, %s18_s13 }
   0x5   :  { %p178_p0 = scmp.ne.s32.totalorder %s18_s13, %s177_s16  ;;  %p183_p2 = scmp.lt.s32.totalorder %s177_s16, %s177_s16 }
   0x7   :  { %p184_p3 = por %p183_p2, %p182_p1 }
   0x9   :  { %p185_p4 = pnand %p184_p3, %p178_p0 }
   0xb   :  { %188 = shalt.err (!%p185_p4)
}
   0xc   :  { %20 = dma.hbm_to_vmem [thread:$0]  %s274_s0, 128, %s18_s13, [#allocation3]  }
   0xd   :  { %s197_s19 = scalar_lea.vmem %s27_s15, 512  ;;  %p202_p6 = scmp.lt.s32.totalorder %s27_s15, %s27_s15 }
   0xe   :  { %p198_p5 = scmp.ne.s32.totalorder %s27_s15, %s197_s19  ;;  %p203_p7 = scmp.lt.s32.totalorder %s197_s19, %s197_s19 }
  0x10   :  { %p204_p8 = por %p203_p7, %p202_p6 }
  0x12   :  { %p205_p9 = pnand %p204_p8, %p198_p5 }
  0x14   :  { %208 = shalt.err (!%p205_p9)
}
  0x15   :  { %s237_s20 = smov 128   ;;  %s238_s21 = smov 8  }
  0x16   :  { %32 = dma.hbm_to_vmem [thread:$0]  %s275_s1, 512, %s27_s15, [#allocation6], %s237_s20, %s237_s20, %s238_s21  }
  0x17   :  { %229 = dma.done.wait [#allocation3], 128  }
  0x18   :  { %230 = vsyncadd [#allocation3], 4294967168 }
  0x19   :  { %231 = dma.done.wait [#allocation6], 512  }
  0x1a   :  { %232 = vsyncadd [#allocation6], 4294966784  ;;  %v239_v0 = vmov 0.0   ;;  %vm240_vm0 = vmmov 0   ;;  %v45_v1 = vld [vmem:[#allocation5 + $0x18] sm:$0xff]  ;;  %v44_v2 = vld [vmem:[#allocation5 + $0x10] sm:$0xff] }
  0x1b   :  { %151 = vmatprep.subr.mxu0 %v239_v0  ;;  %159 = vmatprep.mubr.msk.f32.mxu0 %vm240_vm0, %v239_v0  ;;  %v43_v3 = vld [vmem:[#allocation5 + $0x8] sm:$0xff]  ;;  %v42_v4 = vld [vmem:[#allocation5] sm:$0xff]  ;;  %v41_v5 = vld [vmem:[#allocation2] sm:$0xff]  ;;  %vm53_vm1 = vcmask 261120   ;;  %s241_s24 = smov [#allocation7]  }
  0x1c   :  { %152 = vmatpush3.msra.mxu0 %v45_v1  ;;  %v144_v6 = vld [vmem:[%s276_s2] ss:$0 sm:$0xff]  ;;  %s134_s25 = sshll.u32 %s241_s24, 4  ;;  %s135_s25 = int_to_ptr.vmem [resolvable:$true] %s134_s25 }
  0x1d   :  { %153 = vmatprep.subr.mxu0 %v239_v0  ;;  %s209_s26 = scalar_lea.vmem %s135_s25, 128  ;;  %p214_p11 = scmp.lt.s32.totalorder %s135_s25, %s135_s25 }
  0x1e   :  { %154 = vmatpush3.msra.mxu0 %v44_v2  ;;  %p210_p10 = scmp.ne.s32.totalorder %s135_s25, %s209_s26  ;;  %p215_p12 = scmp.lt.s32.totalorder %s209_s26, %s209_s26 }
  0x1f   :  { %155 = vmatprep.subr.mxu0 %v239_v0 }
  0x20   :  { %156 = vmatpush3.msra.mxu0 %v43_v3  ;;  %p216_p13 = por %p215_p12, %p214_p11 }
  0x21   :  { %157 = vmatprep.subr.mxu0 %v239_v0 }
  0x22   :  { %158 = vmatpush3.msra.mxu0 %v42_v4  ;;  %p217_p0 = pnand %p216_p13, %p210_p10 }
  0x23   :  { %160 = vmatmul.mubr.msk.f32.vlgmr.msra.gmra.mxu0 %vm53_vm1, %v41_v5 }
  0xe3   :  { %v123_v7 = vpop.f32.mrf.mxu0 }
  0xe4   :  { %v124_v8 = vadd.f32 %v144_v6, %v123_v7 }
  0xe5   :  { %v161_v9 = vpop.f32.mrf.mxu0 }
  0xe6   :  { %127 = vst [vmem:[#allocation7] sm:$0xff] %v124_v8 }
  0xe7   :  { %220 = shalt.err (!%p217_p0)
}
  0xe8   :  { %137 = dma.vmem_to_hbm [thread:$0]  %s135_s25, 128, %s277_s3, [#allocation4]  }
  0xe9   :  { %233 = dma.done.wait [#allocation4], 128  }
  0xea   :  { %234 = vsyncadd [#allocation4], 4294967168 }
  0xeb   :  { %141 = vsyncpa [#allocation3], 1 }
  0xec   :  { %142 = vsyncpa [#allocation6], 1 }
  0xed   :  { %143 = vsyncpa [#allocation4], 1 }

</bundles_post_ra>
